<compile_context>
chip_gen: v5e
topology: v5e:2x2
jax: 0.10.0
libtpu: 0.0.40
codegen_flags: <defaults>
</compile_context>

<pallas_src>
import functools

import jax
import jax.numpy as jnp
from jax.experimental import pallas as pl
from jax.experimental.pallas import tpu as pltpu


def _round_up(x, m):
    return (x + m - 1) // m * m


def embed_linear_kernel(x_ref, w_ref, b_ref, out_ref):
    # x_ref  : (tN, D)  gathered embedding rows for this N tile
    # w_ref  : (D, tV)  pre-transposed output-projection weight tile
    # b_ref  : (1, tV)  bias tile
    # out_ref: (tN, tV) logits tile (lane-dense)
    logits = jnp.dot(x_ref[...], w_ref[...], preferred_element_type=jnp.float32)
    out_ref[...] = (logits + b_ref[...]).astype(out_ref.dtype)


@functools.partial(jax.jit, static_argnames=("tile_n", "tile_v", "use_bf16"))
def embedding_model_forward(ids, emb_table, w, b, *, tile_n=512, tile_v=1024,
                            use_bf16=False):
    """ids: (B, S) int; emb_table: (V, D); w: (V, D); b: (V,) -> (B, S, V) f32."""
    B, S = ids.shape
    V, D = emb_table.shape
    N = B * S

    # Wrapper-side embedding gather (one N*D read); replaces the in-kernel
    # per-row VMEM copy loop and the VMEM-resident table.
    # TODO(synk): nn.Embedding raises on out-of-range ids; we clamp instead.
    ids_flat = jnp.clip(ids.reshape(N).astype(jnp.int32), 0, V - 1)
    x = jnp.take(emb_table, ids_flat, axis=0)            # (N, D) f32

    # One-time transpose so the kernel does a plain (tN, D) @ (D, tV).
    w_t = jnp.transpose(w)                               # (D, V)

    compute_dtype = jnp.bfloat16 if use_bf16 else jnp.float32
    x = x.astype(compute_dtype)
    w_t = w_t.astype(compute_dtype)

    # Tile sizes: tN multiple of 8 (sublanes), tV multiple of 128 (lanes).
    tN = _round_up(min(tile_n, _round_up(N, 8)), 8)
    N_pad = _round_up(N, tN)
    tV = _round_up(min(tile_v, _round_up(V, 128)), 128)
    V_pad = _round_up(V, tV)

    if N_pad != N:
        x = jnp.pad(x, ((0, N_pad - N), (0, 0)))
    if V_pad != V:
        w_t = jnp.pad(w_t, ((0, 0), (0, V_pad - V)))
        b = jnp.pad(b, (0, V_pad - V))
    b2 = b.reshape(1, V_pad).astype(jnp.float32)

    # Grid: V tiles OUTER (parallel; weight-stationary), N tiles inner.
    grid = (V_pad // tV, N_pad // tN)

    itemsize = 2 if use_bf16 else 4
    vmem_need = (2 * tN * D * itemsize        # activation tiles (double-buffered)
                 + 2 * D * tV * itemsize      # weight tiles
                 + 2 * tV * 4                 # bias tiles
                 + 2 * tN * tV * 4)           # output tiles
    vmem_limit = int(min(100 * 1024 * 1024, max(32 * 1024 * 1024, 2 * vmem_need)))

    out = pl.pallas_call(
        embed_linear_kernel,
        out_shape=jax.ShapeDtypeStruct((N_pad, V_pad), jnp.float32),
        grid_spec=pltpu.PrefetchScalarGridSpec(
            num_scalar_prefetch=0,
            grid=grid,
            in_specs=[
                pl.BlockSpec((tN, D), lambda j, i: (i, 0)),   # activations (re-streamed, small)
                pl.BlockSpec((D, tV), lambda j, i: (0, j)),   # weight: stationary over inner i
                pl.BlockSpec((1, tV), lambda j, i: (0, j)),   # bias:   stationary over inner i
            ],
            out_specs=pl.BlockSpec((tN, tV), lambda j, i: (i, j)),
        ),
        compiler_params=pltpu.CompilerParams(
            dimension_semantics=("parallel", "arbitrary"),
            vmem_limit_bytes=vmem_limit,
        ),
    )(x, w_t, b2)

    return out[:N, :V].reshape(B, S, V)


if __name__ == "__main__":
    # Small shapes consistent with the module: vocab=128, d_model=32, B=2, S=8.
    vocab_size = 128
    d_model = 32
    batch, seq = 2, 8

    key = jax.random.PRNGKey(0)
    k_ids, k_emb, k_w, k_b = jax.random.split(key, 4)

    ids = jax.random.randint(k_ids, (batch, seq), 0, vocab_size, dtype=jnp.int32)
    emb_table = jax.random.normal(k_emb, (vocab_size, d_model), dtype=jnp.float32) * 0.02
    w = jax.random.normal(k_w, (vocab_size, d_model), dtype=jnp.float32) * 0.02
    b = jax.random.normal(k_b, (vocab_size,), dtype=jnp.float32) * 0.01

    logits = embedding_model_forward(ids, emb_table, w, b)
    logits = jax.block_until_ready(logits)

    # Pure-JAX reference (embedding lookup + linear).
    ref = jnp.take(emb_table, ids, axis=0) @ w.T + b
    assert logits.shape == (batch, seq, vocab_size)
    assert jnp.allclose(logits, ref, atol=1e-5, rtol=1e-5)

    # generate_text equivalent (argmax over vocab) as a plain JAX postprocess.
    _tokens = jax.block_until_ready(jnp.argmax(logits, axis=-1))
    assert _tokens.shape == (batch, seq)

    print("KERNEL_OK")
</pallas_src>

<mosaic_0001>
module attributes {stable_mosaic.version = 11 : i64} {
  func.func @embed_linear_kernel(%arg0: i32, %arg1: i32, %arg2: memref<16x32xf32, #tpu.memory_space<vmem>>, %arg3: memref<32x128xf32, #tpu.memory_space<vmem>>, %arg4: memref<1x128xf32, #tpu.memory_space<vmem>>, %arg5: memref<16x128xf32, #tpu.memory_space<vmem>>) attributes {dimension_semantics = [#tpu.dimension_semantics<parallel>, #tpu.dimension_semantics<arbitrary>], iteration_bounds = array<i64: 1, 1>, scalar_prefetch = 0 : i64, scratch_operands = 0 : i64, tpu.core_type = #tpu.core_type<tc>, window_params = [{transform_indices = @transform_0, window_bounds = array<i64: 16, 32>}, {transform_indices = @transform_1, window_bounds = array<i64: 32, 128>}, {transform_indices = @transform_2, window_bounds = array<i64: 1, 128>}, {transform_indices = @transform_3, window_bounds = array<i64: 16, 128>}]} {
    %c0 = arith.constant 0 : index
    %c0_0 = arith.constant 0 : index
    %0 = vector.load %arg2[%c0, %c0_0] : memref<16x32xf32, #tpu.memory_space<vmem>>, vector<16x32xf32>
    %c0_1 = arith.constant 0 : index
    %c0_2 = arith.constant 0 : index
    %1 = vector.load %arg3[%c0_1, %c0_2] : memref<32x128xf32, #tpu.memory_space<vmem>>, vector<32x128xf32>
    %cst = arith.constant dense<0.000000e+00> : vector<16x128xf32>
    %2 = tpu.matmul %0, %1, %cst {dimension_numbers = #tpu.dot_dimension_numbers<[1], [0], [0], [1], [0, 0, 1, 1], [], []>} : vector<16x32xf32>, vector<32x128xf32>, vector<16x128xf32> -> vector<16x128xf32>
    %c0_3 = arith.constant 0 : index
    %c0_4 = arith.constant 0 : index
    %3 = vector.load %arg4[%c0_3, %c0_4] : memref<1x128xf32, #tpu.memory_space<vmem>>, vector<1x128xf32>
    %4 = vector.broadcast %3 : vector<1x128xf32> to vector<16x128xf32>
    %5 = arith.addf %2, %4 : vector<16x128xf32>
    %c0_5 = arith.constant 0 : index
    %c0_6 = arith.constant 0 : index
    %6 = vector.load %arg5[%c0_5, %c0_6] : memref<16x128xf32, #tpu.memory_space<vmem>>, vector<16x128xf32>
    tpu.vector_store %arg5[%c0_5, %c0_6], %5 {strides = array<i32>} : memref<16x128xf32, #tpu.memory_space<vmem>>, vector<16x128xf32>,
    return
  }
  func.func @transform_0(%arg0: i32, %arg1: i32) -> (i32, i32) {
    %c0_i32 = arith.constant 0 : i32
    %c0_i32_0 = arith.constant 0 : i32
    return %arg1, %c0_i32 : i32, i32
  }
  func.func @transform_1(%arg0: i32, %arg1: i32) -> (i32, i32) {
    %c0_i32 = arith.constant 0 : i32
    %c0_i32_0 = arith.constant 0 : i32
    return %c0_i32, %arg0 : i32, i32
  }
  func.func @transform_2(%arg0: i32, %arg1: i32) -> (i32, i32) {
    %c0_i32 = arith.constant 0 : i32
    %c0_i32_0 = arith.constant 0 : i32
    return %c0_i32, %arg0 : i32, i32
  }
  func.func @transform_3(%arg0: i32, %arg1: i32) -> (i32, i32) {
    %c0_i32 = arith.constant 0 : i32
    return %arg1, %arg0 : i32, i32
  }
}

</mosaic_0001>

<bundles_post_ra>
// kernel: embedding_model_forward.1
= control target key start
LH: loop header
LB: loop body
LE: loop exit
PB: predicated region body
PF: predicated region fallthrough
CT: control target
= control target key end

     0   :  { %s158_s0 = inlined_call_operand.vmem [shape: f32[16,32], index: 0, kind: input, shape index: {}]   ;;  %s159_s1 = inlined_call_operand.vmem [shape: f32[32,128], index: 1, kind: input, shape index: {}]   ;;  %s160_s2 = inlined_call_operand.vmem [shape: f32[1,128], index: 2, kind: input, shape index: {}]   ;;  %s161_s3 = inlined_call_operand.hbm [shape: f32[16,128], index: 3, kind: output, shape index: {}]  }
   0x1   :  { %v20_v0 = vld [vmem:[%s159_s1 + $0x18] sm:$0xff]  ;;  %v19_v1 = vld [vmem:[%s159_s1 + $0x10] sm:$0xff]  ;;  %v18_v2 = vld [vmem:[%s159_s1 + $0x8] sm:$0xff] }
   0x2   :  { %44 = vmatpush.msra.mxu0 %v20_v0  ;;  %77 = vmatpush.msra.mxu1 %v20_v0 }
   0x3   :  { %8 = vsyncpa [#allocation3], 0  ;;  %v17_v3 = vld [vmem:[%s159_s1] sm:$0xff]  ;;  %vm25_vm0 = vcmask 261120   ;;  %v16_v5 = vld [vmem:[%s158_s0 + $0x8] sm:$0xff]  ;;  %s111_s1 = smov [#allocation2]  }
   0x4   :  { %45 = vmatpush.msra.mxu0 %v19_v1  ;;  %78 = vmatpush.msra.mxu1 %v19_v1  ;;  %v15_v4 = vld [vmem:[%s158_s0] sm:$0xff]  ;;  %s61_s26 = sshll.u32 %s111_s1, 4  ;;  %s63_s29 = sshll.u32 %s161_s3, 4  ;;  %s62_s26 = int_to_ptr.vmem [resolvable:$true] %s61_s26  ;;  %s64_s29 = int_to_ptr.hbm [resolvable:$true] %s63_s29 }
   0x5   :  { %v84_v6 = vld [vmem:[%s160_s2] ss:$0 sm:$0xff]  ;;  %s112_s0 = smov 128   ;;  %s113_s30 = smov 8  }
   0x6   :  { %46 = vmatpush.msra.mxu0 %v18_v2  ;;  %79 = vmatpush.msra.mxu1 %v18_v2 }
   0x8   :  { %47 = vmatpush.msra.mxu0 %v17_v3  ;;  %80 = vmatpush.msra.mxu1 %v17_v3 }
   0x9   :  { %75 = vmatmul.msk.f32.vlgmr.msra.gmra.mxu0 %vm25_vm0, %v15_v4  ;;  %76 = vmatmul.msk.f32.vlgmr.msra.gmra.mxu1 %vm25_vm0, %v16_v5 }
  0x86   :  { %v49_v7 = vpop.f32.mrf.mxu0  ;;  %v52_v8 = vpop.f32.mrf.mxu1 }
  0x87   :  { %v50_v9 = vadd.f32 %v84_v6, %v49_v7  ;;  %v53_v10 = vadd.f32 %v84_v6, %v52_v8 }
  0x89   :  { %55 = vst [vmem:[#allocation2] sm:$0xff] %v50_v9 }
  0x8a   :  { %56 = vst [vmem:[#allocation2 + $0x8] sm:$0xff] %v53_v10 }
  0x8b   :  { %69 = dma.vmem_to_hbm [thread:$0]  %s62_s26, 256, %s64_s29, [#allocation3], %s112_s0, %s112_s0, %s113_s30  }
  0x8c   :  { %109 = dma.done.wait [#allocation3], 256  }
  0x8d   :  { %110 = vsyncadd [#allocation3], 4294967040 }
  0x8e   :  { %74 = vsyncpa [#allocation3], 1 }

</bundles_post_ra>
